<compile_context>
chip_gen: v6e
topology: v6e:2x2x1
jax: 0.10.0
libtpu: 0.0.40
codegen_flags: <defaults>
</compile_context>

<pallas_src>
import jax
import jax.numpy as jnp
from jax import lax
from jax.experimental import pallas as pl
from jax.experimental.pallas import tpu as pltpu


_NEG_INF = -1.0e9  # same fill value as torch masked_fill in the reference


def _round_up(x, m):
    return ((x + m - 1) // m) * m


def _make_attn_kernel(scale, has_mask):
    """Builds the flash-attention style kernel body."""

    def kernel(*refs):
        if has_mask:
            q_ref, k_ref, v_ref, mask_ref, o_ref, m_sc, l_sc, acc_sc = refs
        else:
            q_ref, k_ref, v_ref, o_ref, m_sc, l_sc, acc_sc = refs
            mask_ref = None

        ki = pl.program_id(2)

        @pl.when(ki == 0)
        def _init():
            m_sc[...] = jnp.full(m_sc.shape, -jnp.inf, dtype=m_sc.dtype)
            l_sc[...] = jnp.zeros(l_sc.shape, dtype=l_sc.dtype)
            acc_sc[...] = jnp.zeros(acc_sc.shape, dtype=acc_sc.dtype)

        q = q_ref[...]                     # (tq, d_k)
        k = k_ref[...]                     # (tk, d_k)

        # scores on the MXU with f32 accumulation: (tq, tk)
        s = lax.dot_general(
            q, k, (((1,), (1,)), ((), ())),
            preferred_element_type=jnp.float32) * scale

        if has_mask:
            # nonzero mask entry == "masked out" (PyTorch masked_fill semantics)
            s = jnp.where(mask_ref[...] != 0, jnp.float32(_NEG_INF), s)

        m_prev = m_sc[...]                                   # (tq, 1)
        m_new = jnp.maximum(m_prev, s.max(axis=-1, keepdims=True))
        alpha = jnp.exp(m_prev - m_new)
        p = jnp.exp(s - m_new)                               # (tq, tk)

        l_sc[...] = alpha * l_sc[...] + p.sum(axis=-1, keepdims=True)
        acc_sc[...] = alpha * acc_sc[...] + jnp.dot(
            p.astype(v_ref.dtype), v_ref[...],
            preferred_element_type=jnp.float32)
        m_sc[...] = m_new

        @pl.when(ki == pl.num_programs(2) - 1)
        def _finalize():
            o_ref[...] = (acc_sc[...] / l_sc[...]).astype(o_ref.dtype)

    return kernel


def self_attention(q, k, v, att_mask=None, *, d_k=None,
                   block_q=256, block_k=256,
                   vmem_limit_bytes=64 * 1024 * 1024):
    """q: [bz, len_q, D], k: [bz, len_k, D], v: [bz, len_k, Dv],
    att_mask: optional [bz, len_q, len_k] (nonzero = masked / padding).
    Returns [bz, len_q, Dv]."""
    bz, len_q, qdim = q.shape
    _, len_k, kdim = k.shape
    _, len_v, d_v = v.shape
    assert kdim == qdim and len_v == len_k

    if d_k is None:
        d_k = qdim
    scale = 1.0 / float(d_k) ** 0.5

    # ---- tile sizes ---------------------------------------------------------
    # tq: sublane dim of q / out / mask tiles  -> multiple of 8
    # tk: sublane dim of k / v tiles and lane dim of the mask tile
    #     -> multiple of 128 when there is more than one kv tile,
    #        otherwise it equals the (padded) full key length.
    tq = _round_up(len_q, 8) if len_q <= block_q else block_q
    tk = _round_up(len_k, 8) if len_k <= block_k else block_k

    len_q_p = _round_up(len_q, tq)
    len_k_p = _round_up(len_k, tk)
    pad_q = len_q_p - len_q
    pad_k = len_k_p - len_k

    if pad_q:
        q = jnp.pad(q, ((0, 0), (0, pad_q), (0, 0)))
    if pad_k:
        k = jnp.pad(k, ((0, 0), (0, pad_k), (0, 0)))
        v = jnp.pad(v, ((0, 0), (0, pad_k), (0, 0)))

    # A mask is needed if the user gave one, or if key padding was added
    # (padded keys must not contribute to the softmax).
    need_mask = (att_mask is not None) or (pad_k > 0)
    if need_mask:
        if att_mask is None:
            mask = jnp.zeros((bz, len_q, len_k), jnp.float32)
        else:
            mask = (att_mask != 0).astype(jnp.float32)
        mask = jnp.pad(mask, ((0, 0), (0, pad_q), (0, pad_k)),
                       constant_values=1.0)          # padded keys masked out

    n_q = len_q_p // tq
    n_k = len_k_p // tk
    grid = (bz, n_q, n_k)

    q_spec = pl.BlockSpec((None, tq, qdim), lambda b, qi, ki: (b, qi, 0))
    k_spec = pl.BlockSpec((None, tk, qdim), lambda b, qi, ki: (b, ki, 0))
    v_spec = pl.BlockSpec((None, tk, d_v), lambda b, qi, ki: (b, ki, 0))
    o_spec = pl.BlockSpec((None, tq, d_v), lambda b, qi, ki: (b, qi, 0))

    in_specs = [q_spec, k_spec, v_spec]
    args = [q, k, v]
    if need_mask:
        in_specs.append(
            pl.BlockSpec((None, tq, tk), lambda b, qi, ki: (b, qi, ki)))
        args.append(mask)

    out = pl.pallas_call(
        _make_attn_kernel(scale, need_mask),
        out_shape=jax.ShapeDtypeStruct((bz, len_q_p, d_v), v.dtype),
        grid_spec=pltpu.PrefetchScalarGridSpec(
            num_scalar_prefetch=0,
            grid=grid,
            in_specs=in_specs,
            out_specs=o_spec,
            scratch_shapes=[
                pltpu.VMEM((tq, 1), jnp.float32),    # running max
                pltpu.VMEM((tq, 1), jnp.float32),    # running sum
                pltpu.VMEM((tq, d_v), jnp.float32),  # output accumulator
            ],
        ),
        compiler_params=pltpu.CompilerParams(
            dimension_semantics=("parallel", "parallel", "arbitrary"),
            vmem_limit_bytes=vmem_limit_bytes,
        ),
    )(*args)

    if pad_q:
        out = out[:, :len_q, :]
    return out


if __name__ == "__main__":
    bz, len_q, len_k, d_k, d_v = 2, 8, 8, 32, 32

    key = jax.random.PRNGKey(0)
    kq, kk, kv, km = jax.random.split(key, 4)
    q = jax.random.normal(kq, (bz, len_q, d_k), jnp.float32)
    k = jax.random.normal(kk, (bz, len_k, d_k), jnp.float32)
    v = jax.random.normal(kv, (bz, len_k, d_v), jnp.float32)

    # mask: nonzero = padding position (masked out); keep first key visible
    att_mask = (jax.random.uniform(km, (bz, len_q, len_k)) < 0.3).astype(jnp.int32)
    att_mask = att_mask.at[:, :, 0].set(0)

    # ---- masked path --------------------------------------------------------
    out = jax.block_until_ready(self_attention(q, k, v, att_mask))

    scale = 1.0 / d_k ** 0.5
    s = jnp.einsum("bqd,bkd->bqk", q, k) * scale
    s_masked = jnp.where(att_mask != 0, _NEG_INF, s)
    ref = jnp.einsum("bqk,bkd->bqd", jax.nn.softmax(s_masked, axis=-1), v)

    assert out.shape == (bz, len_q, d_v)
    assert jnp.allclose(out, ref, atol=1e-4, rtol=1e-4), \
        float(jnp.max(jnp.abs(out - ref)))

    # ---- no-mask path -------------------------------------------------------
    out_nm = jax.block_until_ready(self_attention(q, k, v, None))
    ref_nm = jnp.einsum("bqk,bkd->bqd", jax.nn.softmax(s, axis=-1), v)
    assert jnp.allclose(out_nm, ref_nm, atol=1e-4, rtol=1e-4), \
        float(jnp.max(jnp.abs(out_nm - ref_nm)))

    print("KERNEL_OK")
</pallas_src>

<mosaic_0001>
module attributes {stable_mosaic.version = 11 : i64} {
  func.func @kernel(%arg0: i32, %arg1: i32, %arg2: i32, %arg3: memref<1x8x32xf32, #tpu.memory_space<vmem>>, %arg4: memref<1x8x32xf32, #tpu.memory_space<vmem>>, %arg5: memref<1x8x32xf32, #tpu.memory_space<vmem>>, %arg6: memref<1x8x8xf32, #tpu.memory_space<vmem>>, %arg7: memref<1x8x32xf32, #tpu.memory_space<vmem>>, %arg8: memref<8x1xf32, #tpu.memory_space<vmem>>, %arg9: memref<8x1xf32, #tpu.memory_space<vmem>>, %arg10: memref<8x32xf32, #tpu.memory_space<vmem>>) attributes {dimension_semantics = [#tpu.dimension_semantics<parallel>, #tpu.dimension_semantics<parallel>, #tpu.dimension_semantics<arbitrary>], iteration_bounds = array<i64: 2, 1, 1>, scalar_prefetch = 0 : i64, scratch_operands = 3 : i64, tpu.core_type = #tpu.core_type<tc>, window_params = [{transform_indices = @transform_0, window_bounds = array<i64: 1, 8, 32>}, {transform_indices = @transform_1, window_bounds = array<i64: 1, 8, 32>}, {transform_indices = @transform_2, window_bounds = array<i64: 1, 8, 32>}, {transform_indices = @transform_3, window_bounds = array<i64: 1, 8, 8>}, {transform_indices = @transform_4, window_bounds = array<i64: 1, 8, 32>}]} {
    %c0_i32 = arith.constant 0 : i32
    %0 = arith.cmpi eq, %arg2, %c0_i32 : i32
    %1 = arith.extui %0 : i1 to i32
    %c0_i32_0 = arith.constant 0 : i32
    %2 = arith.cmpi ne, %1, %c0_i32_0 : i32
    scf.if %2 {
      %cst_32 = arith.constant 0xFF800000 : f32
      %43 = vector.broadcast %cst_32 : f32 to vector<8x1xf32>
      %c0_33 = arith.constant 0 : index
      %c0_34 = arith.constant 0 : index
      %44 = vector.load %arg8[%c0_33, %c0_34] : memref<8x1xf32, #tpu.memory_space<vmem>>, vector<8x1xf32>
      tpu.vector_store %arg8[%c0_33, %c0_34], %43 {strides = array<i32>} : memref<8x1xf32, #tpu.memory_space<vmem>>, vector<8x1xf32>,
      %cst_35 = arith.constant 0.000000e+00 : f32
      %45 = vector.broadcast %cst_35 : f32 to vector<8x1xf32>
      %c0_36 = arith.constant 0 : index
      %c0_37 = arith.constant 0 : index
      %46 = vector.load %arg9[%c0_36, %c0_37] : memref<8x1xf32, #tpu.memory_space<vmem>>, vector<8x1xf32>
      tpu.vector_store %arg9[%c0_36, %c0_37], %45 {strides = array<i32>} : memref<8x1xf32, #tpu.memory_space<vmem>>, vector<8x1xf32>,
      %cst_38 = arith.constant 0.000000e+00 : f32
      %47 = vector.broadcast %cst_38 : f32 to vector<8x32xf32>
      %c0_39 = arith.constant 0 : index
      %c0_40 = arith.constant 0 : index
      %48 = vector.load %arg10[%c0_39, %c0_40] : memref<8x32xf32, #tpu.memory_space<vmem>>, vector<8x32xf32>
      tpu.vector_store %arg10[%c0_39, %c0_40], %47 {strides = array<i32>} : memref<8x32xf32, #tpu.memory_space<vmem>>, vector<8x32xf32>,
    } else {
    }
    %c0 = arith.constant 0 : index
    %c0_1 = arith.constant 0 : index
    %c0_2 = arith.constant 0 : index
    %3 = vector.load %arg3[%c0, %c0_1, %c0_2] : memref<1x8x32xf32, #tpu.memory_space<vmem>>, vector<1x8x32xf32>
    %4 = vector.shape_cast %3 : vector<1x8x32xf32> to vector<8x32xf32>
    %c0_3 = arith.constant 0 : index
    %c0_4 = arith.constant 0 : index
    %c0_5 = arith.constant 0 : index
    %5 = vector.load %arg4[%c0_3, %c0_4, %c0_5] : memref<1x8x32xf32, #tpu.memory_space<vmem>>, vector<1x8x32xf32>
    %6 = vector.shape_cast %5 : vector<1x8x32xf32> to vector<8x32xf32>
    %cst = arith.constant dense<0.000000e+00> : vector<8x8xf32>
    %7 = tpu.matmul %4, %6, %cst {dimension_numbers = #tpu.dot_dimension_numbers<[1], [1], [0], [0], [0, 0, 1, 0], [], []>} : vector<8x32xf32>, vector<8x32xf32>, vector<8x8xf32> -> vector<8x8xf32>
    %cst_6 = arith.constant 0.176776692 : f32
    %8 = vector.broadcast %cst_6 : f32 to vector<8x8xf32>
    %9 = arith.mulf %7, %8 : vector<8x8xf32>
    %c0_7 = arith.constant 0 : index
    %c0_8 = arith.constant 0 : index
    %c0_9 = arith.constant 0 : index
    %10 = vector.load %arg6[%c0_7, %c0_8, %c0_9] : memref<1x8x8xf32, #tpu.memory_space<vmem>>, vector<1x8x8xf32>
    %11 = vector.shape_cast %10 : vector<1x8x8xf32> to vector<8x8xf32>
    %cst_10 = arith.constant 0.000000e+00 : f32
    %12 = vector.broadcast %cst_10 : f32 to vector<8x8xf32>
    %13 = arith.cmpf one, %11, %12 : vector<8x8xf32>
    %cst_11 = arith.constant -1.000000e+09 : f32
    %14 = vector.broadcast %cst_11 : f32 to vector<8x8xf32>
    %15 = arith.select %13, %14, %9 : vector<8x8xi1>, vector<8x8xf32>
    %c0_12 = arith.constant 0 : index
    %c0_13 = arith.constant 0 : index
    %16 = vector.load %arg8[%c0_12, %c0_13] : memref<8x1xf32, #tpu.memory_space<vmem>>, vector<8x1xf32>
    %cst_14 = arith.constant dense<0xFF800000> : vector<8xf32>
    %17 = vector.multi_reduction <maximumf>, %15, %cst_14 [1] : vector<8x8xf32> to vector<8xf32>
    %18 = vector.shape_cast %17 : vector<8xf32> to vector<8x1xf32>
    %19 = arith.maximumf %16, %18 : vector<8x1xf32>
    %20 = arith.subf %16, %19 : vector<8x1xf32>
    %21 = math.exp %20 : vector<8x1xf32>
    %22 = vector.broadcast %19 : vector<8x1xf32> to vector<8x8xf32>
    %23 = arith.subf %15, %22 : vector<8x8xf32>
    %24 = math.exp %23 : vector<8x8xf32>
    %c0_15 = arith.constant 0 : index
    %c0_16 = arith.constant 0 : index
    %25 = vector.load %arg9[%c0_15, %c0_16] : memref<8x1xf32, #tpu.memory_space<vmem>>, vector<8x1xf32>
    %26 = arith.mulf %21, %25 : vector<8x1xf32>
    %cst_17 = arith.constant dense<0.000000e+00> : vector<8xf32>
    %27 = vector.multi_reduction <add>, %24, %cst_17 [1] : vector<8x8xf32> to vector<8xf32>
    %28 = vector.shape_cast %27 : vector<8xf32> to vector<8x1xf32>
    %29 = arith.addf %26, %28 : vector<8x1xf32>
    %c0_18 = arith.constant 0 : index
    %c0_19 = arith.constant 0 : index
    %30 = vector.load %arg9[%c0_18, %c0_19] : memref<8x1xf32, #tpu.memory_space<vmem>>, vector<8x1xf32>
    tpu.vector_store %arg9[%c0_18, %c0_19], %29 {strides = array<i32>} : memref<8x1xf32, #tpu.memory_space<vmem>>, vector<8x1xf32>,
    %c0_20 = arith.constant 0 : index
    %c0_21 = arith.constant 0 : index
    %31 = vector.load %arg10[%c0_20, %c0_21] : memref<8x32xf32, #tpu.memory_space<vmem>>, vector<8x32xf32>
    %32 = vector.broadcast %21 : vector<8x1xf32> to vector<8x32xf32>
    %33 = arith.mulf %32, %31 : vector<8x32xf32>
    %c0_22 = arith.constant 0 : index
    %c0_23 = arith.constant 0 : index
    %c0_24 = arith.constant 0 : index
    %34 = vector.load %arg5[%c0_22, %c0_23, %c0_24] : memref<1x8x32xf32, #tpu.memory_space<vmem>>, vector<1x8x32xf32>
    %35 = vector.shape_cast %34 : vector<1x8x32xf32> to vector<8x32xf32>
    %cst_25 = arith.constant dense<0.000000e+00> : vector<8x32xf32>
    %36 = tpu.matmul %24, %35, %cst_25 {dimension_numbers = #tpu.dot_dimension_numbers<[1], [0], [0], [1], [0, 0, 1, 1], [], []>} : vector<8x8xf32>, vector<8x32xf32>, vector<8x32xf32> -> vector<8x32xf32>
    %37 = arith.addf %33, %36 : vector<8x32xf32>
    %c0_26 = arith.constant 0 : index
    %c0_27 = arith.constant 0 : index
    %38 = vector.load %arg10[%c0_26, %c0_27] : memref<8x32xf32, #tpu.memory_space<vmem>>, vector<8x32xf32>
    tpu.vector_store %arg10[%c0_26, %c0_27], %37 {strides = array<i32>} : memref<8x32xf32, #tpu.memory_space<vmem>>, vector<8x32xf32>,
    %c0_28 = arith.constant 0 : index
    %c0_29 = arith.constant 0 : index
    %39 = vector.load %arg8[%c0_28, %c0_29] : memref<8x1xf32, #tpu.memory_space<vmem>>, vector<8x1xf32>
    tpu.vector_store %arg8[%c0_28, %c0_29], %19 {strides = array<i32>} : memref<8x1xf32, #tpu.memory_space<vmem>>, vector<8x1xf32>,
    %c0_i32_30 = arith.constant 0 : i32
    %40 = arith.cmpi eq, %arg2, %c0_i32_30 : i32
    %41 = arith.extui %40 : i1 to i32
    %c0_i32_31 = arith.constant 0 : i32
    %42 = arith.cmpi ne, %41, %c0_i32_31 : i32
    scf.if %42 {
      %c0_32 = arith.constant 0 : index
      %c0_33 = arith.constant 0 : index
      %43 = vector.load %arg10[%c0_32, %c0_33] : memref<8x32xf32, #tpu.memory_space<vmem>>, vector<8x32xf32>
      %c0_34 = arith.constant 0 : index
      %c0_35 = arith.constant 0 : index
      %44 = vector.load %arg9[%c0_34, %c0_35] : memref<8x1xf32, #tpu.memory_space<vmem>>, vector<8x1xf32>
      %45 = vector.broadcast %44 : vector<8x1xf32> to vector<8x32xf32>
      %46 = arith.divf %43, %45 : vector<8x32xf32>
      %c0_36 = arith.constant 0 : index
      %c0_37 = arith.constant 0 : index
      %c0_38 = arith.constant 0 : index
      %47 = vector.load %arg7[%c0_36, %c0_37, %c0_38] : memref<1x8x32xf32, #tpu.memory_space<vmem>>, vector<1x8x32xf32>
      %48 = vector.shape_cast %47 : vector<1x8x32xf32> to vector<8x32xf32>
      %49 = vector.shape_cast %46 : vector<8x32xf32> to vector<1x8x32xf32>
      tpu.vector_store %arg7[%c0_36, %c0_37, %c0_38], %49 {strides = array<i32>} : memref<1x8x32xf32, #tpu.memory_space<vmem>>, vector<1x8x32xf32>,
    } else {
    }
    return
  }
  func.func @transform_0(%arg0: i32, %arg1: i32, %arg2: i32) -> (i32, i32, i32) {
    %c0_i32 = arith.constant 0 : i32
    %c0_i32_0 = arith.constant 0 : i32
    return %arg0, %arg1, %c0_i32 : i32, i32, i32
  }
  func.func @transform_1(%arg0: i32, %arg1: i32, %arg2: i32) -> (i32, i32, i32) {
    %c0_i32 = arith.constant 0 : i32
    %c0_i32_0 = arith.constant 0 : i32
    return %arg0, %arg2, %c0_i32 : i32, i32, i32
  }
  func.func @transform_2(%arg0: i32, %arg1: i32, %arg2: i32) -> (i32, i32, i32) {
    %c0_i32 = arith.constant 0 : i32
    %c0_i32_0 = arith.constant 0 : i32
    return %arg0, %arg2, %c0_i32 : i32, i32, i32
  }
  func.func @transform_3(%arg0: i32, %arg1: i32, %arg2: i32) -> (i32, i32, i32) {
    %c0_i32 = arith.constant 0 : i32
    return %arg0, %arg1, %arg2 : i32, i32, i32
  }
  func.func @transform_4(%arg0: i32, %arg1: i32, %arg2: i32) -> (i32, i32, i32) {
    %c0_i32 = arith.constant 0 : i32
    %c0_i32_0 = arith.constant 0 : i32
    return %arg0, %arg1, %c0_i32 : i32, i32, i32
  }
}

</mosaic_0001>

<bundles_post_ra>
// kernel: tpu_custom_call.1
= control target key start
LH: loop header
LB: loop body
LE: loop exit
PB: predicated region body
PF: predicated region fallthrough
CT: control target
= control target key end

     0   :  { %s1332_s0 = inlined_call_operand.hbm [shape: f32[2,8,32], index: 0, kind: input, shape index: {}]   ;;  %s1333_s1 = inlined_call_operand.hbm [shape: f32[2,8,32], index: 1, kind: input, shape index: {}]   ;;  %s1334_s2 = inlined_call_operand.hbm [shape: f32[2,8,32], index: 2, kind: input, shape index: {}]   ;;  %s1335_s3 = inlined_call_operand.hbm [shape: f32[2,8,8], index: 3, kind: input, shape index: {}]   ;;  %s1336_s4 = inlined_call_operand.hbm [shape: f32[2,8,32], index: 4, kind: output, shape index: {}]  }
   0x1   :  { %1340 = sst [smem:[#allocation22_spill]] %s1333_s1 }
   0x2   :  { %9 = vsyncpa [#allocation6], 0 }
   0x3   :  { %11 = vsyncpa [#allocation6 + $0x1], 0 }
   0x4   :  { %12 = vsyncpa [#allocation9], 0 }
   0x5   :  { %14 = vsyncpa [#allocation9 + $0x1], 0 }
   0x6   :  { %15 = vsyncpa [#allocation12], 0 }
   0x7   :  { %17 = vsyncpa [#allocation12 + $0x1], 0 }
   0x8   :  { %18 = vsyncpa [#allocation7], 0 }
   0x9   :  { %20 = vsyncpa [#allocation7 + $0x1], 0  ;;  %s1103_s15 = smov 0   ;;  %s1105_s16 = smov 0  }
   0xa   :  { %s1107_s17 = smov 0   ;;  %s1109_s18 = smov 0  }
   0xb   :  { %s1111_s19 = smov 0   ;;  %s1113_s20 = smov 0  }
   0xc LB: > { %1341 = sst [smem:[#allocation18_spill]] %s1055_s17  ;;  %s1134_s21 = sadd.s32 4294967295, %s1067_s20   ;;  %s1067_s20 = sphi %s1113_s20, %s26_s20   ;;  %s1063_s19 = sphi %s1111_s19, %s1356_s19   ;;  %s1059_s18 = sphi %s1109_s18, %s1355_s18   ;;  %s1055_s17 = sphi %s1107_s17, %s1354_s17   ;;  %s1051_s16 = sphi %s1105_s16, %s1358_s16   ;;  %s1047_s15 = sphi %s1103_s15, %s1357_s15  }
   0xd   : > { %1342 = sst [smem:[#allocation19_spill]] %s1063_s19  ;;  %s740_s22 = sadd.s32 4294967294, %s1067_s20  }
   0xe   : > { %s45_s23 = sadd.s32 1, %s1063_s19  ;;  %s54_s24 = sadd.s32 1, %s1055_s17 }
   0xf   : > { %p47_p0 = scmp.ge.s32.totalorder %s45_s23, 2  ;;  %p61_p1 = scmp.ne.s32.totalorder %s1055_s17, %s1051_s16 }
  0x10   : > { %p62_p2 = scmp.eq.s32.totalorder %s1067_s20, 0  ;;  %p67_p3 = scmp.ne.s32.totalorder %s1051_s16, %s1047_s15 }
  0x11   : > { %s1360_s23 = smov (%p47_p0, %s45_s23), 0  ;;  %p68_p5 = scmp.eq.s32.totalorder %s1134_s21, 0 }
  0x12   : > { %1343 = sst [smem:[#allocation20_spill]] %s1360_s23  ;;  %p1146_p4 = por %p62_p2, %p61_p1 }
  0x13   : > { %s49_s26 = ssub.s32 %s1063_s19, %s1360_s23  ;;  %p179_p6 = scmp.eq.s32.totalorder %s1134_s21, 1 }
  0x14   : > { %p52_p7 = scmp.eq.s32.totalorder %s49_s26, 0  ;;  %p1154_p8 = por %p68_p5, %p67_p3 }
  0x15   : > { %p1158_p9 = por %p179_p6, %p61_p1  ;;  %p185_p10 = scmp.eq.s32.totalorder %s740_s22, 1 }
  0x16   : > { %s1163_s29 = scalar_select %p52_p7, %s1055_s17, %s54_s24  }
  0x17   : > { %p1165_p11 = por %p185_p10, %p67_p3  ;;  %p805_p13 = scmp.lt.s32.totalorder %s1067_s20, 2 }
  0x18   : > { %1347 = sst [smem:[#allocation21_spill]] %s1163_s29  ;;  %s1172_s5 = sand.u32 1, %s1055_s17  }
  0x19   : > { %s1175_s6 = sshll.u32 %s1172_s5, 3  ;;  %s1178_s7 = sshll.u32 %s1063_s19, 7 }
  0x1a   : > { %p1182_p0 = pnand %p805_p13, %p1146_p4  ;;  %s224_s9 = sand.u32 1, %s1067_s20  }
  0x1b   : > { %s1350_s1 = sld [smem:[#allocation22_spill]]  ;;  %s228_s13 = scalar_lea.vmem [#allocation8], %s1175_s6 }
  0x1c   : > { %s236_s14 = sshll.u32 %s228_s13, 4  ;;  %p751_p1 = scmp.ge.s32.totalorder %s1067_s20, 1  ;;  %s237_s14 = int_to_ptr.vmem [resolvable:$true] %s236_s14 }
  0x1d   : > { %p280_p2 = scmp.lt.s32.totalorder %s1067_s20, 3  ;;  %s1194_s22 = scalar_lea.sflag [#allocation9], %s224_s9 }
  0x1e   : > { %p869_p3 = pneg %p1182_p0  ;;  %s880_s24 = scalar_lea.vmem %s237_s14, 128 }
  0x1f   : > { %p881_p4 = scmp.ne.s32.totalorder %s237_s14, %s880_s24  ;;  %s1069_s25 = smov [#allocation8]  }
  0x20   : > { %s885_s26 = sshll.u32 %s1069_s25, 4  ;;  %s886_s26 = int_to_ptr.vmem [resolvable:$false] %s885_s26 }
  0x21   : > { %s234_s12 = scalar_lea.hbm %s1350_s1, %s1178_s7  ;;  %p883_p5 = pnand %p881_p4, %p869_p3 }
  0x22   : > { %s887_s10 = scalar_lea.vmem %s886_s26, 256  ;;  %p888_p7 = scmp.lt.s32.totalorder %s237_s14, %s886_s26 }
  0x23   : > { %p884_p6 = pneg %p883_p5  ;;  %p889_p10 = scmp.lt.s32.totalorder %s887_s10, %s880_s24 }
  0x25   : > { %p890_p13 = por %p889_p10, %p888_p7 }
  0x27   : > { %p891_p12 = pnand %p890_p13, %p884_p6 }
  0x29   : > { %894 = shalt.err (!%p891_p12)
}
  0x2a   : > { %794 = dma.hbm_to_vmem [thread:$0]  (!%p1182_p0), %s234_s12, 128, %s237_s14, %s1194_s22  }
  0x2b   : > { %p1208_p4 = pnand %p751_p1, %p280_p2  ;;  %s215_s24 = scalar_lea.hbm %s1332_s0, %s1178_s7 }
  0x2c   : > { %s209_s25 = scalar_lea.vmem [#allocation5], %s1175_s6  ;;  %s253_s23 = scalar_lea.hbm %s1334_s2, %s1178_s7 }
  0x2d   : > { %s217_s26 = sshll.u32 %s209_s25, 4  ;;  %s206_s19 = scalar_lea.sflag [#allocation6], %s1172_s5  ;;  %s218_s26 = int_to_ptr.vmem [resolvable:$true] %s217_s26 }
  0x2e   : > { %s908_s29 = scalar_lea.vmem %s218_s26, 128  ;;  %s1070_s12 = smov [#allocation5]  }
  0x2f   : > { %p909_p12 = scmp.ne.s32.totalorder %s218_s26, %s908_s29  ;;  %s913_s14 = sshll.u32 %s1070_s12, 4  ;;  %s914_s14 = int_to_ptr.vmem [resolvable:$false] %s913_s14 }
  0x30   : > { %s915_s17 = scalar_lea.vmem %s914_s14, 256  ;;  %p916_p5 = scmp.lt.s32.totalorder %s218_s26, %s914_s14 }
  0x31   : > { %p911_p1 = pnand %p909_p12, %p869_p3  ;;  %p917_p6 = scmp.lt.s32.totalorder %s915_s17, %s908_s29 }
  0x33   : > { %p912_p2 = pneg %p911_p1  ;;  %p918_p7 = por %p917_p6, %p916_p5 }
  0x35   : > { %p919_p10 = pnand %p918_p7, %p912_p2 }
  0x37   : > { %922 = shalt.err (!%p919_p10)
}
  0x38   : > { %791 = dma.hbm_to_vmem [thread:$0]  (!%p1182_p0), %s215_s24, 128, %s218_s26, %s206_s19  }
  0x39   : > { %s247_s1 = scalar_lea.vmem [#allocation10], %s1175_s6  ;;  %s1071_s25 = smov [#allocation10]  }
  0x3a   : > { %s255_s11 = sshll.u32 %s247_s1, 4  ;;  %s941_s10 = sshll.u32 %s1071_s25, 4  ;;  %s256_s11 = int_to_ptr.vmem [resolvable:$true] %s255_s11  ;;  %s942_s10 = int_to_ptr.vmem [resolvable:$false] %s941_s10 }
  0x3b   : > { %s936_s13 = scalar_lea.vmem %s256_s11, 128  ;;  %s943_s17 = scalar_lea.vmem %s942_s10, 256 }
  0x3c   : > { %p937_p13 = scmp.ne.s32.totalorder %s256_s11, %s936_s13  ;;  %p944_p2 = scmp.lt.s32.totalorder %s256_s11, %s942_s10 }
  0x3d   : > { %p945_p5 = scmp.lt.s32.totalorder %s943_s17, %s936_s13 }
  0x3e   : > { %p939_p12 = pnand %p937_p13, %p869_p3 }
  0x3f   : > { %p946_p6 = por %p945_p5, %p944_p2 }
  0x40   : > { %p940_p1 = pneg %p939_p12 }
  0x42   : > { %p947_p7 = pnand %p946_p6, %p940_p1 }
  0x44   : > { %950 = shalt.err (!%p947_p7)
}
  0x45   : > { %797 = dma.hbm_to_vmem [thread:$0]  (!%p1182_p0), %s253_s23, 128, %s256_s11, %s1194_s22  }
  0x46   : > { %s273_s12 = scalar_lea.hbm %s1335_s3, %s1178_s7  ;;  %s266_s14 = scalar_lea.vmem [#allocation11], %s1175_s6 }
  0x47   : > { %s275_s1 = sshll.u32 %s266_s14, 4  ;;  %s263_s13 = scalar_lea.sflag [#allocation12], %s1172_s5  ;;  %s276_s1 = int_to_ptr.vmem [resolvable:$true] %s275_s1 }
  0x48   : > { %s964_s25 = scalar_lea.vmem %s276_s1, 128  ;;  %s1072_s10 = smov [#allocation11]  }
  0x49   : > { %p965_p10 = scmp.ne.s32.totalorder %s276_s1, %s964_s25  ;;  %s969_s17 = sshll.u32 %s1072_s10, 4  ;;  %s970_s17 = int_to_ptr.vmem [resolvable:$false] %s969_s17 }
  0x4a   : > { %s971_s19 = scalar_lea.vmem %s970_s17, 256  ;;  %p972_p1 = scmp.lt.s32.totalorder %s276_s1, %s970_s17 }
  0x4b   : > { %p967_p13 = pnand %p965_p10, %p869_p3  ;;  %p973_p2 = scmp.lt.s32.totalorder %s971_s19, %s964_s25 }
  0x4d   : > { %p968_p12 = pneg %p967_p13  ;;  %p974_p5 = por %p973_p2, %p972_p1 }
  0x4f   : > { %p975_p6 = pnand %p974_p5, %p968_p12 }
  0x51   : > { %978 = shalt.err (!%p975_p6)
}
  0x52   : > { %800 = dma.hbm_to_vmem [thread:$0]  (!%p1182_p0), %s273_s12, 128, %s276_s1, %s263_s13  }
  0x53   : > { %284 = sbr.rel (%p1208_p4) target bundleno = 884 (0x374), region = 36  ;;  %s1253_s23 = sand.u32 (!%p1208_p4), 1, %s1051_s16  }
  0x54   : > { %s1256_s5 = sshll.u32 (!%p1208_p4), %s1253_s23, 3  ;;  %s287_s6 = scalar_lea.sflag (!%p1208_p4), [#allocation6], %s1253_s23 }
  0x55   : > { %s290_s7 = scalar_lea.vmem (!%p1208_p4), [#allocation5], %s1256_s5 }
  0x58   : > { %1030 = dma.done.wait (%p1154_p8), %s287_s6, 128  }
  0x59   : > { %1032 = vsyncadd (%p1154_p8), %s287_s6, 4294967168  ;;  %s295_s8 = sand.u32 1, %s1134_s21   ;;  %s299_s9 = scalar_lea.vmem [#allocation8], %s1256_s5 }
  0x5a   : > { %s296_s22 = scalar_lea.sflag [#allocation9], %s295_s8 }
  0x5b   : > { %1034 = dma.done.wait (%p1154_p8), %s296_s22, 256  }
  0x5c   : > { %1036 = vsyncadd (%p1154_p8), %s296_s22, 4294967040  ;;  %s308_s11 = scalar_lea.vmem [#allocation10], %s1256_s5  ;;  %s314_s29 = scalar_lea.sflag [#allocation12], %s1253_s23 }
  0x5d   : > { %s317_s24 = scalar_lea.vmem [#allocation11], %s1256_s5 }
  0x5e   : > { %1038 = dma.done.wait (%p1154_p8), %s314_s29, 128  }
  0x5f   : > { %1040 = vsyncadd (%p1154_p8), %s314_s29, 4294967168  ;;  %vm364_vm0 = vcmask 261120   ;;  %v1073_v0 = vmov 0.0   ;;  %vm1074_vm1 = vmmov 0   ;;  %v367_v1 = vld [vmem:[%s299_s9] sm:$0xff]  ;;  %v366_v2 = vld [vmem:[%s290_s7] sm:$0xff] }
  0x60   : > { %768 = vmatprep.subr.mxu0 %v1073_v0  ;;  %365 = vst.msk [vmem:[#allocation4] sm:$0xff] %vm364_vm0, %v1073_v0  ;;  %770 = vmatprep.mubr.msk.f32.mxu0 %vm1074_vm1, %v1073_v0  ;;  %vm361_vm2 = vcmask 7168   ;;  %v1075_v3 = vmov -inf   ;;  %v446_v4 = vld [vmem:[%s317_s24] sm:$0xff]  ;;  %vm450_vm4 = vcmask 64512   ;;  %v1076_v10 = vmov 0  }
  0x61   : > { %773 = vmatprep.subr.mxu1 %v1073_v0  ;;  %775 = vmatprep.mubr.msk.f32.mxu1 %vm1074_vm1, %v1073_v0  ;;  %362 = vst.msk [vmem:[#allocation2] sm:$0xff] %vm361_vm2, %v1075_v3  ;;  %363 = vst.msk [vmem:[#allocation3] sm:$0xff] %vm361_vm2, %v1073_v0  ;;  %vm447_vm3 = vcmp.ne.f32.partialorder %v446_v4, 0.0  ;;  %v481_v15 = vld [vmem:[%s308_s11] sm:$0xff]  ;;  %s761_s21 = sshll.u32 %s1059_s18, 7  ;;  %s356_s27 = scalar_lea.vmem [#allocation13], %s1256_s5 }
  0x62   : > { %769 = vmatpush3.xpose.msk.msra.mxu0 %vm364_vm0, %v367_v1  ;;  %859 = vset.pattern.permute.xlu0 %v1076_v10  ;;  %s586_s26 = sshll.u32 %s356_s27, 4  ;;  %s584_s1 = scalar_lea.hbm %s1336_s4, %s761_s21  ;;  %s587_s26 = int_to_ptr.vmem [resolvable:$true] %s586_s26 }
  0x63   : > { %860 = vset.pattern.permute.xlu1 %v1076_v10  ;;  %774 = vmatpush3.msra.mxu1 %v481_v15  ;;  %s572_s13 = scalar_lea.sflag [#allocation7], %s1253_s23  ;;  %s979_s25 = scalar_lea.vmem %s587_s26, 128 }
  0x64   : > { %p980_p8 = scmp.ne.s32.totalorder %s587_s26, %s979_s25  ;;  %s1077_s10 = smov [#allocation13]  }
  0x65   : > { %771 = vmatmul.mubr.msk.f32.vlgmr.msra.gmra.mxu0 %vm364_vm0, %v366_v2  ;;  %s983_s18 = sshll.u32 %s1077_s10, 4  ;;  %s984_s18 = int_to_ptr.vmem [resolvable:$false] %s983_s18 }
  0x66   : > { %p981_p0 = pnand %p980_p8, %p1158_p9  ;;  %s985_s17 = scalar_lea.vmem %s984_s18, 256 }
  0x67   : > { %v474_v31 = vld [vmem:[#allocation4] sm:$0xff]  ;;  %p986_p4 = scmp.lt.s32.totalorder %s587_s26, %s984_s18  ;;  %p987_p7 = scmp.lt.s32.totalorder %s985_s17, %s979_s25 }
  0x68   : > { %v449_v11 = vld [vmem:[#allocation2] sm:$0xff]  ;;  %v466_v23 = vld [vmem:[#allocation3] sm:$0xff]  ;;  %p982_p3 = pneg %p981_p0 }
  0x69   : > { %p988_p10 = por %p987_p7, %p986_p4 }
  0x6b   : > { %p989_p13 = pnand %p988_p10, %p982_p3 }
 0x125   : > { %v441_v5 = vpop.f32.mrf.mxu0 }
 0x126   : > { %v445_v6 = vmul.f32 0.17677669, %v441_v5 }
 0x127   : > { %v772_v7 = vpop.f32.mrf.mxu0 }
 0x128   : > { %v448_v8 = vsel %vm447_vm3, -1e+09, %v445_v6 }
 0x129   : > { %v451_v9 = vsel %vm450_vm4, %v448_v8, -inf }
 0x12a   : > { %452 = vmax.xlane.f32.xlu0 %v451_v9 }
 0x1b3   : > { %v453_v12 = vpop.xlane.xlu0 %452 }
 0x1b4   : > { %v454_v13 = vmax.f32 %v449_v11, %v453_v12 }
 0x1b6   : > { %v455_v14 = vsub.f32 %v449_v11, %v454_v13  ;;  %557 = vst.msk [vmem:[#allocation2] sm:$0xff] %vm361_vm2, %v454_v13  ;;  %460 = vperm.xlu0 %859, %v454_v13  }
 0x1b8   : > { %v456_v21 = vmul.f32 1.442695, %v455_v14 }
 0x231   : > { %v461_v16 = vpop.permute.xlu0 %460 }
 0x232   : > { %v463_v17 = vsub.f32 %v448_v8, %v461_v16 }
 0x234   : > { %v464_v18 = vmul.f32 1.442695, %v463_v17 }
 0x236   : > { %861 = vpow2.f32 %v464_v18 }
 0x237   : > { %863 = vpow2.f32 %v456_v21 }
 0x243   : > { %v862_v19 = vpop.eup %861 }
 0x244   : > { %776 = vmatmul.mubr.msk.f32.vlgmr.msra.gmra.mxu1 %vm450_vm4, %v862_v19  ;;  %v468_v20 = vsel %vm450_vm4, %v862_v19, 0.0  ;;  %v864_v22 = vpop.eup %863 }
 0x245   : > { %469 = vadd.xlane.f32.xlu1 %v468_v20  ;;  %v467_v24 = vmul.f32 %v864_v22, %v466_v23 }
 0x2ce   : > { %v470_v25 = vpop.xlane.xlu1 %469 }
 0x2cf   : > { %v471_v26 = vadd.f32 %v470_v25, %v467_v24 }
 0x2d1   : > { %473 = vst.msk [vmem:[#allocation3] sm:$0xff] %vm361_vm2, %v471_v26 }
 0x2d8   : > { %v562_v27 = vld [vmem:[#allocation3] sm:$0xff] }
 0x2d9   : > { %565 = vperm.xlu1 %860, %v562_v27  }
 0x2dd   : > { %477 = vperm.xlu1 %860, %v864_v22  }
 0x304   : > { %v551_v28 = vpop.f32.mrf.mxu1 }
 0x306   : > { %v777_v29 = vpop.f32.mrf.mxu1 }
 0x354   : > { %v566_v30 = vpop.permute.xlu1 %565 }
 0x355   : > { %865 = vrcp.f32 %v566_v30 }
 0x358   : > { %v478_v32 = vpop.permute.xlu1 %477 }
 0x359   : > { %v480_v33 = vmul.f32 %v478_v32, %v474_v31 }
 0x35b   : > { %v555_v34 = vadd.f32 %v551_v28, %v480_v33 }
 0x35d   : > { %556 = vst.msk [vmem:[#allocation4] sm:$0xff] %vm364_vm0, %v555_v34 }
 0x362   : > { %v866_v35 = vpop.eup %865 }
 0x364   : > { %v561_v36 = vld [vmem:[#allocation4] sm:$0xff] }
 0x365   : > { %v569_v37 = vmul.f32 %v866_v35, %v561_v36 }
 0x367   : > { %570 = vst.msk [vmem:[%s356_s27] sm:$0xff] %vm364_vm0, %v569_v37 }
 0x368   : > { %992 = shalt.err (!%p989_p13)
}
 0x369   : > { %s993_s19 = scalar_lea.hbm %s584_s1, 128  ;;  %s997_s6 = scalar_lea.hbm %s1336_s4, 256 }
 0x36a   : > { %p994_p12 = scmp.ne.s32.totalorder %s584_s1, %s993_s19  ;;  %p998_p5 = scmp.lt.s32.totalorder %s584_s1, %s1336_s4 }
 0x36b   : > { %p999_p6 = scmp.lt.s32.totalorder %s997_s6, %s993_s19 }
 0x36c   : > { %p995_p1 = pnand %p994_p12, %p1158_p9 }
 0x36d   : > { %p1000_p8 = por %p999_p6, %p998_p5 }
 0x36e   : > { %p996_p2 = pneg %p995_p1 }
 0x370   : > { %p1001_p0 = pnand %p1000_p8, %p996_p2 }
 0x372   : > { %1004 = shalt.err (!%p1001_p0)
}
 0x373   : > { %786 = dma.vmem_to_hbm [thread:$0]  (%p1158_p9), %s587_s26, 128, %s584_s1, %s572_s13  }
 0x374 PF: > { %s598_s22 = sand.u32 1, %s1047_s15   ;;  %p1352_p3 = scmp.ge.s32.totalorder %s1067_s20, 2 }
 0x375   : > { %s599_s9 = scalar_lea.sflag [#allocation7], %s598_s22 }
 0x376   : > { %p802_p4 = pnand %p1352_p3, %p1165_p11 }
 0x378   : > { %p803_p7 = pneg %p802_p4 }
 0x37a   : > { %1042 = dma.done.wait (%p803_p7), %s599_s9, 128  }
 0x37b   : > { %1044 = vsyncadd (%p803_p7), %s599_s9, 4294967168  ;;  %s26_s20 = sadd.s32 1, %s1067_s20   ;;  %s1353_s11 = sld [smem:[#allocation18_spill]] }
 0x37c   : > { %p23_p10 = scmp.ge.s32.totalorder %s26_s20, 4   ;;  %s1354_s17 = sld [smem:[#allocation21_spill]] }
 0x37d   : > { %s1355_s18 = sld [smem:[#allocation19_spill]]  ;;  %s1357_s15 = smov %s1051_s16 }
 0x37e   : > { %s1356_s19 = sld [smem:[#allocation20_spill]]  ;;  %25 = sbr.rel (!%p23_p10) target bundleno = 12 (0xc), region = 126 }
 0x381   : > { %s1358_s16 = smov %s1353_s11 }
 0x383   :  { %604 = vsyncpa [#allocation6], 1 }
 0x384   :  { %606 = vsyncpa [#allocation6 + $0x1], 1 }
 0x385   :  { %607 = vsyncpa [#allocation9], 1 }
 0x386   :  { %609 = vsyncpa [#allocation9 + $0x1], 1 }
 0x387   :  { %610 = vsyncpa [#allocation12], 1 }
 0x388   :  { %612 = vsyncpa [#allocation12 + $0x1], 1 }
 0x389   :  { %613 = vsyncpa [#allocation7], 1 }
 0x38a   :  { %615 = vsyncpa [#allocation7 + $0x1], 1 }

</bundles_post_ra>
